<compile_context>
chip_gen: v6e
topology: v6e:2x2x1
jax: 0.10.0
libtpu: 0.0.40
codegen_flags: <defaults>
</compile_context>

<pallas_src>
import functools

import numpy as np
import jax
import jax.numpy as jnp
from jax import lax
from jax.experimental import pallas as pl
from jax.experimental.pallas import tpu as pltpu


# Contract dim 0 of both operands (A^T B fed to the MXU in transposed-LHS form).
_TN_DIMS = (((0,), (0,)), ((), ()))


def _round_up(x, m):
    return ((x + m - 1) // m) * m


def _sublane_granule(itemsize):
    # 8 rows/vreg for 4-byte dtypes, 16 for 2-byte (bf16), 32 for 1-byte.
    return 8 * max(1, 4 // int(itemsize))


def _detect_num_tensorcores():
    """Best-effort TensorCore count (1 on v5e/v6e, 2 on megacore parts)."""
    get_info = getattr(pltpu, "get_tpu_info", None)
    if get_info is None:
        return 1
    try:
        info = get_info()
    except Exception:
        return 1
    for name in ("num_cores", "core_count", "num_tensorcores",
                 "num_tensor_cores", "tensor_core_count",
                 "cores_per_chip", "num_cores_per_chip"):
        v = getattr(info, name, None)
        if isinstance(v, int) and v >= 1:
            return min(v, 2)
    return 1


def _stats_kernel(o_ref, y_ref, gram_ref, cross_ref, csum_ref, *,
                  steps_per_slice, tile_rows, rows_total):
    """Accumulate sufficient statistics for one (slice, step) tile.

    o_ref : (tile_rows, fold*F) outputs tile, native dtype (rows lane-folded)
    y_ref : (tile_rows, fold)   target tile
    gram_ref  : (fold*F, fold*F) f32 resident accumulator   sum O^T O
    cross_ref : (fold, fold*F)   f32 resident accumulator   sum Y^T O
    csum_ref  : (1, fold*F)      f32 resident accumulator   column sums of O
    """
    p = pl.program_id(0)
    s = pl.program_id(1)

    # Output blocks are resident across the "arbitrary" step axis -> init once.
    @pl.when(s == 0)
    def _init():
        gram_ref[...] = jnp.zeros_like(gram_ref)
        cross_ref[...] = jnp.zeros_like(cross_ref)
        csum_ref[...] = jnp.zeros_like(csum_ref)

    o = o_ref[...]
    # x^T y goes through the MXU in the outputs' dtype; the y-only moments
    # (sum_y, sum_y^2) are computed in f32 in the wrapper, so low-precision
    # outputs do not degrade them.
    y = y_ref[...].astype(o.dtype)

    def _accumulate(o_t, y_t):
        # Two matmuls, both accumulating in f32 on the MXU (the old aug^T aug
        # matmul is gone).
        gram_ref[...] += lax.dot_general(o_t, o_t, _TN_DIMS,
                                         preferred_element_type=jnp.float32)
        cross_ref[...] += lax.dot_general(y_t, o_t, _TN_DIMS,
                                          preferred_element_type=jnp.float32)
        # Column sums on the otherwise idle VPU (free under the MXU/HBM bound).
        csum_ref[...] += jnp.sum(o_t.astype(jnp.float32), axis=0, keepdims=True)

    last_step = (rows_total - 1) // tile_rows          # python int
    tail_valid = rows_total - last_step * tile_rows    # python int in (0, tile_rows]

    if tail_valid == tile_rows:
        # Rows divide the tiling evenly: no masking code is emitted at all.
        _accumulate(o, y)
    else:
        step_global = p * steps_per_slice + s

        @pl.when(step_global != last_step)
        def _full():
            _accumulate(o, y)

        @pl.when(step_global == last_step)
        def _tail():
            # Only the single partial tail tile pays for the row mask; the
            # out-of-bounds rows Pallas hands us contain unspecified data.
            rid = lax.broadcasted_iota(jnp.int32, (tile_rows, 1), 0)
            keep = rid < tail_valid
            _accumulate(jnp.where(keep, o, jnp.zeros_like(o)),
                        jnp.where(keep, y, jnp.zeros_like(y)))


def _finalize_kernel(gram_ref, cross_ref, csum_ref, ystat_ref, loss_ref, *,
                     lambda1, lambda2, total_t, num_factors, fold):
    """Combine per-slice statistics and evaluate the full scalar loss."""
    F = num_factors
    Tf = jnp.float32(total_t)

    gram_f = jnp.sum(gram_ref[...], axis=0)    # (fold*F, fold*F)
    cross_f = jnp.sum(cross_ref[...], axis=0)  # (fold, fold*F)
    csum_f = jnp.sum(csum_ref[...], axis=0)    # (1, fold*F)

    # Recombine the fold-diagonal blocks into the true statistics.
    gram = gram_f[0:F, 0:F]                    # (F, F)  O^T O
    xty = cross_f[0:1, 0:F]                    # (1, F)  sum_t o[t, i] * y[t]
    s = csum_f[:, 0:F]                         # (1, F)  column sums of outputs
    for j in range(1, fold):
        gram = gram + gram_f[j * F:(j + 1) * F, j * F:(j + 1) * F]
        xty = xty + cross_f[j:j + 1, j * F:(j + 1) * F]
        s = s + csum_f[:, j * F:(j + 1) * F]

    sy = ystat_ref[0:1, 0:1]                   # (1, 1) sum y   (f32, from wrapper)
    sy2 = ystat_ref[0:1, 1:2]                  # (1, 1) sum y^2

    # Centered cross-products between factors.
    cov = gram - (jnp.transpose(s) * s) / Tf                         # (F, F)
    row = lax.broadcasted_iota(jnp.int32, (F, F), 0)
    col = lax.broadcasted_iota(jnp.int32, (F, F), 1)
    eye = row == col
    diag_row = jnp.sum(jnp.where(eye, cov, 0.0), axis=0, keepdims=True)  # (1, F)
    diag_col = jnp.sum(jnp.where(eye, cov, 0.0), axis=1, keepdims=True)  # (F, 1)

    var_y = sy2 - sy * sy / Tf                                       # (1, 1)

    # term1: -mean_i corr(outputs[:, i], target)
    num = xty - s * sy / Tf                                          # (1, F)
    den = jnp.sqrt(diag_row * var_y)                                 # (1, F)
    r = num / den
    r = jnp.where(jnp.isnan(r), jnp.zeros_like(r), r)
    term1 = -jnp.mean(r, keepdims=True)                              # (1, 1)

    # term2: -lambda1 * corr(sum_i outputs[:, i], target)
    S = jnp.sum(s, keepdims=True)                                    # (1, 1)
    SS = jnp.sum(gram, keepdims=True)                                # (1, 1)
    SXY = jnp.sum(xty, keepdims=True)                                # (1, 1)
    num2 = SXY - S * sy / Tf
    den2 = jnp.sqrt((SS - S * S / Tf) * var_y)
    r2 = num2 / den2
    r2 = jnp.where(jnp.isnan(r2), jnp.zeros_like(r2), r2)
    term2 = -lambda1 * r2                                            # (1, 1)

    # term3: lambda2 * mean(corrcoef(outputs.T) ** 2)  (corrcoef clips to [-1, 1])
    denom = jnp.sqrt(diag_col * diag_row)                            # (F, F)
    cmat = jnp.clip(cov / denom, -1.0, 1.0)
    term3 = lambda2 * jnp.mean(cmat * cmat, keepdims=True)           # (1, 1)

    loss_ref[...] = term1 + term2 + term3


def custom_loss(outputs, target, lambda1, lambda2, *,
                tile_t=None, num_slices=None, input_budget_bytes=16 << 20):
    """Pallas implementation of CustomLoss.forward(outputs, target)."""
    T, F = outputs.shape
    target = jnp.reshape(target, (-1,))
    assert target.shape[0] == T, "target must have T elements"

    # y-only moments in f32, once, in the wrapper (the old aug^T aug matmul).
    y_f32 = target.astype(jnp.float32)
    ystat = jnp.stack([jnp.sum(y_f32), jnp.sum(y_f32 * y_f32)]).reshape(1, 2)

    # ---- fold rows into lanes while fold*F <= 128 and fold | T ---------------
    fold = max(1, 128 // F)
    while fold > 1 and T % fold != 0:
        fold //= 2
    fold = max(1, fold)
    rows_total = T // fold
    foldF = fold * F

    o2 = outputs.reshape(rows_total, foldF) if fold > 1 else outputs
    # Folded target block (rows, fold); fold==1 falls back to (T, 1).
    # TODO(synk): for fold == 1 the y stream still lane-pads 1 -> 128 in VMEM.
    y2 = target.reshape(rows_total, fold) if fold > 1 else target.reshape(T, 1)

    o_isz = jnp.dtype(outputs.dtype).itemsize
    y_isz = jnp.dtype(target.dtype).itemsize
    granule = max(_sublane_granule(o_isz), _sublane_granule(y_isz))

    # ---- VMEM-aware tile sizing (account for the lane-padded y footprint) ----
    o_row_bytes = _round_up(foldF, 128) * o_isz
    y_row_bytes = _round_up(fold, 128) * y_isz
    budget_rows = max(granule,
                      input_budget_bytes // (2 * (o_row_bytes + y_row_bytes)))
    if tile_t is not None:
        budget_rows = min(budget_rows, max(1, int(tile_t) // fold))
    if rows_total <= budget_rows:
        tile_rows = rows_total          # one full-extent block, no masking
    else:
        tile_rows = max(granule,
                        (min(budget_rows, rows_total) // granule) * granule)
    total_steps = -(-rows_total // tile_rows)

    # ---- slice the row stream: one slice per TensorCore --------------------
    if num_slices is None:
        num_slices = _detect_num_tensorcores()
    num_slices = max(1, int(num_slices))
    while num_slices > 1 and total_steps % num_slices != 0:
        num_slices -= 1                 # keep exact grid coverage (no OOB blocks)
    steps_per_slice = total_steps // num_slices

    # ---- real VMEM footprint -> vmem_limit_bytes -----------------------------
    def _blk_bytes(r, c, isz):
        return _round_up(r, _sublane_granule(isz)) * _round_up(c, 128) * isz

    est = (2 * (_blk_bytes(tile_rows, foldF, o_isz)
                + _blk_bytes(tile_rows, fold, y_isz))
           + 2 * (_blk_bytes(foldF, foldF, 4) + _blk_bytes(fold, foldF, 4)
                  + _blk_bytes(1, foldF, 4)))
    vmem_limit = int(min(max(est + (6 << 20), 32 << 20), 96 << 20))

    row_map = lambda p, s: (p * steps_per_slice + s, 0)

    gram, cross, csum = pl.pallas_call(
        functools.partial(_stats_kernel,
                          steps_per_slice=steps_per_slice,
                          tile_rows=tile_rows,
                          rows_total=rows_total),
        out_shape=(
            jax.ShapeDtypeStruct((num_slices, foldF, foldF), jnp.float32),
            jax.ShapeDtypeStruct((num_slices, fold, foldF), jnp.float32),
            jax.ShapeDtypeStruct((num_slices, 1, foldF), jnp.float32),
        ),
        grid_spec=pltpu.PrefetchScalarGridSpec(
            num_scalar_prefetch=0,
            grid=(num_slices, steps_per_slice),
            in_specs=[
                pl.BlockSpec((tile_rows, foldF), row_map),
                pl.BlockSpec((tile_rows, fold), row_map),
            ],
            out_specs=[
                pl.BlockSpec((None, foldF, foldF), lambda p, s: (p, 0, 0)),
                pl.BlockSpec((None, fold, foldF), lambda p, s: (p, 0, 0)),
                pl.BlockSpec((None, 1, foldF), lambda p, s: (p, 0, 0)),
            ]),
        compiler_params=pltpu.CompilerParams(
            dimension_semantics=("parallel", "arbitrary"),
            vmem_limit_bytes=vmem_limit),
    )(o2, y2)   # native dtypes streamed; no wrapper-side pad or upcast

    loss = pl.pallas_call(
        functools.partial(_finalize_kernel,
                          lambda1=float(lambda1), lambda2=float(lambda2),
                          total_t=T, num_factors=F, fold=fold),
        out_shape=jax.ShapeDtypeStruct((1, 1), jnp.float32),
    )(gram, cross, csum, ystat)
    return loss[0, 0]


def reference_loss(outputs, target, lambda1, lambda2):
    """Pure numpy reproduction of the PyTorch forward (float64)."""
    o = np.asarray(outputs, dtype=np.float64)
    y = np.asarray(target, dtype=np.float64)

    def pearson(x, yy):
        xm = x - x.mean()
        ym = yy - yy.mean()
        num = (xm * ym).sum()
        den = np.sqrt((xm ** 2).sum() * (ym ** 2).sum())
        r = num / den
        return 0.0 if np.isnan(r) else r

    corrs = np.array([pearson(o[:, i], y) for i in range(o.shape[1])])
    term1 = -corrs.mean()
    term2 = -lambda1 * pearson(o.sum(1), y)
    c = np.clip(np.corrcoef(o.T), -1.0, 1.0)
    term3 = lambda2 * (c ** 2).mean()
    return term1 + term2 + term3


def _check(T, F, lambda1, lambda2, k1, k2, **kw):
    outputs = jax.random.normal(k1, (T, F), dtype=jnp.float32)
    target = jax.random.normal(k2, (T,), dtype=jnp.float32)
    loss = jax.block_until_ready(custom_loss(outputs, target, lambda1, lambda2, **kw))
    ref = reference_loss(outputs, target, lambda1, lambda2)
    if not np.allclose(float(loss), float(ref), rtol=2e-3, atol=2e-3):
        raise AssertionError(
            f"mismatch (T={T}, F={F}): kernel={float(loss)} ref={float(ref)}")


if __name__ == "__main__":
    key = jax.random.PRNGKey(0)
    k1, k2, k3, k4, k5, k6, k7, k8 = jax.random.split(key, 8)
    lambda1, lambda2 = 0.5, 0.1

    # Case 1: T=128 stocks x 64 factors (lane-folded, single block, 1 slice).
    _check(128, 64, lambda1, lambda2, k1, k2)

    # Case 2: folded multi-step stream split across 2 slices, no tail.
    _check(192, 64, lambda1, lambda2, k3, k4, tile_t=32, num_slices=2)

    # Case 3: folded stream, 2 slices, masked partial tail tile.
    _check(200, 64, lambda1, lambda2, k5, k6, tile_t=64, num_slices=2)

    # Case 4: odd T -> unfolded path, multi-step, masked partial tail tile.
    _check(131, 64, lambda1, lambda2, k7, k8, tile_t=48)

    print("KERNEL_OK")
</pallas_src>

<mosaic_0001>
module attributes {stable_mosaic.version = 11 : i64} {
  func.func @_stats_kernel(%arg0: i32, %arg1: i32, %arg2: memref<64x128xf32, #tpu.memory_space<vmem>>, %arg3: memref<64x2xf32, #tpu.memory_space<vmem>>, %arg4: memref<1x128x128xf32, #tpu.memory_space<vmem>>, %arg5: memref<1x2x128xf32, #tpu.memory_space<vmem>>, %arg6: memref<1x1x128xf32, #tpu.memory_space<vmem>>) attributes {dimension_semantics = [#tpu.dimension_semantics<parallel>, #tpu.dimension_semantics<arbitrary>], iteration_bounds = array<i64: 1, 1>, scalar_prefetch = 0 : i64, scratch_operands = 0 : i64, tpu.core_type = #tpu.core_type<tc>, window_params = [{transform_indices = @transform_0, window_bounds = array<i64: 64, 128>}, {transform_indices = @transform_1, window_bounds = array<i64: 64, 2>}, {transform_indices = @transform_2, window_bounds = array<i64: 1, 128, 128>}, {transform_indices = @transform_3, window_bounds = array<i64: 1, 2, 128>}, {transform_indices = @transform_4, window_bounds = array<i64: 1, 1, 128>}]} {
    %c0_i32 = arith.constant 0 : i32
    %0 = arith.cmpi eq, %arg1, %c0_i32 : i32
    %1 = arith.extui %0 : i1 to i32
    %c0_i32_0 = arith.constant 0 : i32
    %2 = arith.cmpi ne, %1, %c0_i32_0 : i32
    scf.if %2 {
      %cst_24 = arith.constant 0.000000e+00 : f32
      %27 = vector.broadcast %cst_24 : f32 to vector<128x128xf32>
      %c0_25 = arith.constant 0 : index
      %c0_26 = arith.constant 0 : index
      %c0_27 = arith.constant 0 : index
      %28 = vector.load %arg4[%c0_25, %c0_26, %c0_27] : memref<1x128x128xf32, #tpu.memory_space<vmem>>, vector<1x128x128xf32>
      %29 = vector.shape_cast %28 : vector<1x128x128xf32> to vector<128x128xf32>
      %30 = vector.shape_cast %27 : vector<128x128xf32> to vector<1x128x128xf32>
      tpu.vector_store %arg4[%c0_25, %c0_26, %c0_27], %30 {strides = array<i32>} : memref<1x128x128xf32, #tpu.memory_space<vmem>>, vector<1x128x128xf32>,
      %cst_28 = arith.constant 0.000000e+00 : f32
      %31 = vector.broadcast %cst_28 : f32 to vector<2x128xf32>
      %c0_29 = arith.constant 0 : index
      %c0_30 = arith.constant 0 : index
      %c0_31 = arith.constant 0 : index
      %32 = vector.load %arg5[%c0_29, %c0_30, %c0_31] : memref<1x2x128xf32, #tpu.memory_space<vmem>>, vector<1x2x128xf32>
      %33 = vector.shape_cast %32 : vector<1x2x128xf32> to vector<2x128xf32>
      %34 = vector.shape_cast %31 : vector<2x128xf32> to vector<1x2x128xf32>
      tpu.vector_store %arg5[%c0_29, %c0_30, %c0_31], %34 {strides = array<i32>} : memref<1x2x128xf32, #tpu.memory_space<vmem>>, vector<1x2x128xf32>,
      %cst_32 = arith.constant 0.000000e+00 : f32
      %35 = vector.broadcast %cst_32 : f32 to vector<1x128xf32>
      %c0_33 = arith.constant 0 : index
      %c0_34 = arith.constant 0 : index
      %c0_35 = arith.constant 0 : index
      %36 = vector.load %arg6[%c0_33, %c0_34, %c0_35] : memref<1x1x128xf32, #tpu.memory_space<vmem>>, vector<1x1x128xf32>
      %37 = vector.shape_cast %36 : vector<1x1x128xf32> to vector<1x128xf32>
      %38 = vector.shape_cast %35 : vector<1x128xf32> to vector<1x1x128xf32>
      tpu.vector_store %arg6[%c0_33, %c0_34, %c0_35], %38 {strides = array<i32>} : memref<1x1x128xf32, #tpu.memory_space<vmem>>, vector<1x1x128xf32>,
    } else {
    }
    %c0 = arith.constant 0 : index
    %c0_1 = arith.constant 0 : index
    %3 = vector.load %arg2[%c0, %c0_1] : memref<64x128xf32, #tpu.memory_space<vmem>>, vector<64x128xf32>
    %c0_2 = arith.constant 0 : index
    %c0_3 = arith.constant 0 : index
    %4 = vector.load %arg3[%c0_2, %c0_3] : memref<64x2xf32, #tpu.memory_space<vmem>>, vector<64x2xf32>
    %c0_4 = arith.constant 0 : index
    %c0_5 = arith.constant 0 : index
    %c0_6 = arith.constant 0 : index
    %5 = vector.load %arg4[%c0_4, %c0_5, %c0_6] : memref<1x128x128xf32, #tpu.memory_space<vmem>>, vector<1x128x128xf32>
    %6 = vector.shape_cast %5 : vector<1x128x128xf32> to vector<128x128xf32>
    %cst = arith.constant dense<0.000000e+00> : vector<128x128xf32>
    %7 = tpu.matmul %3, %3, %cst {dimension_numbers = #tpu.dot_dimension_numbers<[0], [0], [1], [1], [0, 1, 1, 1], [], []>} : vector<64x128xf32>, vector<64x128xf32>, vector<128x128xf32> -> vector<128x128xf32>
    %8 = arith.addf %6, %7 : vector<128x128xf32>
    %c0_7 = arith.constant 0 : index
    %c0_8 = arith.constant 0 : index
    %c0_9 = arith.constant 0 : index
    %9 = vector.load %arg4[%c0_7, %c0_8, %c0_9] : memref<1x128x128xf32, #tpu.memory_space<vmem>>, vector<1x128x128xf32>
    %10 = vector.shape_cast %9 : vector<1x128x128xf32> to vector<128x128xf32>
    %11 = vector.shape_cast %8 : vector<128x128xf32> to vector<1x128x128xf32>
    tpu.vector_store %arg4[%c0_7, %c0_8, %c0_9], %11 {strides = array<i32>} : memref<1x128x128xf32, #tpu.memory_space<vmem>>, vector<1x128x128xf32>,
    %c0_10 = arith.constant 0 : index
    %c0_11 = arith.constant 0 : index
    %c0_12 = arith.constant 0 : index
    %12 = vector.load %arg5[%c0_10, %c0_11, %c0_12] : memref<1x2x128xf32, #tpu.memory_space<vmem>>, vector<1x2x128xf32>
    %13 = vector.shape_cast %12 : vector<1x2x128xf32> to vector<2x128xf32>
    %cst_13 = arith.constant dense<0.000000e+00> : vector<2x128xf32>
    %14 = tpu.matmul %4, %3, %cst_13 {dimension_numbers = #tpu.dot_dimension_numbers<[0], [0], [1], [1], [0, 1, 1, 1], [], []>} : vector<64x2xf32>, vector<64x128xf32>, vector<2x128xf32> -> vector<2x128xf32>
    %15 = arith.addf %13, %14 : vector<2x128xf32>
    %c0_14 = arith.constant 0 : index
    %c0_15 = arith.constant 0 : index
    %c0_16 = arith.constant 0 : index
    %16 = vector.load %arg5[%c0_14, %c0_15, %c0_16] : memref<1x2x128xf32, #tpu.memory_space<vmem>>, vector<1x2x128xf32>
    %17 = vector.shape_cast %16 : vector<1x2x128xf32> to vector<2x128xf32>
    %18 = vector.shape_cast %15 : vector<2x128xf32> to vector<1x2x128xf32>
    tpu.vector_store %arg5[%c0_14, %c0_15, %c0_16], %18 {strides = array<i32>} : memref<1x2x128xf32, #tpu.memory_space<vmem>>, vector<1x2x128xf32>,
    %c0_17 = arith.constant 0 : index
    %c0_18 = arith.constant 0 : index
    %c0_19 = arith.constant 0 : index
    %19 = vector.load %arg6[%c0_17, %c0_18, %c0_19] : memref<1x1x128xf32, #tpu.memory_space<vmem>>, vector<1x1x128xf32>
    %20 = vector.shape_cast %19 : vector<1x1x128xf32> to vector<1x128xf32>
    %cst_20 = arith.constant dense<0.000000e+00> : vector<128xf32>
    %21 = vector.multi_reduction <add>, %3, %cst_20 [0] : vector<64x128xf32> to vector<128xf32>
    %22 = vector.shape_cast %21 : vector<128xf32> to vector<1x128xf32>
    %23 = arith.addf %20, %22 : vector<1x128xf32>
    %c0_21 = arith.constant 0 : index
    %c0_22 = arith.constant 0 : index
    %c0_23 = arith.constant 0 : index
    %24 = vector.load %arg6[%c0_21, %c0_22, %c0_23] : memref<1x1x128xf32, #tpu.memory_space<vmem>>, vector<1x1x128xf32>
    %25 = vector.shape_cast %24 : vector<1x1x128xf32> to vector<1x128xf32>
    %26 = vector.shape_cast %23 : vector<1x128xf32> to vector<1x1x128xf32>
    tpu.vector_store %arg6[%c0_21, %c0_22, %c0_23], %26 {strides = array<i32>} : memref<1x1x128xf32, #tpu.memory_space<vmem>>, vector<1x1x128xf32>,
    return
  }
  func.func @transform_0(%arg0: i32, %arg1: i32) -> (i32, i32) {
    %c1_i32 = arith.constant 1 : i32
    %0 = arith.muli %arg0, %c1_i32 : i32
    %1 = arith.addi %0, %arg1 : i32
    %c0_i32 = arith.constant 0 : i32
    %c0_i32_0 = arith.constant 0 : i32
    return %1, %c0_i32 : i32, i32
  }
  func.func @transform_1(%arg0: i32, %arg1: i32) -> (i32, i32) {
    %c1_i32 = arith.constant 1 : i32
    %0 = arith.muli %arg0, %c1_i32 : i32
    %1 = arith.addi %0, %arg1 : i32
    %c0_i32 = arith.constant 0 : i32
    %c0_i32_0 = arith.constant 0 : i32
    return %1, %c0_i32 : i32, i32
  }
  func.func @transform_2(%arg0: i32, %arg1: i32) -> (i32, i32, i32) {
    %c0_i32 = arith.constant 0 : i32
    %c0_i32_0 = arith.constant 0 : i32
    %c0_i32_1 = arith.constant 0 : i32
    return %arg0, %c0_i32, %c0_i32_0 : i32, i32, i32
  }
  func.func @transform_3(%arg0: i32, %arg1: i32) -> (i32, i32, i32) {
    %c0_i32 = arith.constant 0 : i32
    %c0_i32_0 = arith.constant 0 : i32
    %c0_i32_1 = arith.constant 0 : i32
    return %arg0, %c0_i32, %c0_i32_0 : i32, i32, i32
  }
  func.func @transform_4(%arg0: i32, %arg1: i32) -> (i32, i32, i32) {
    %c0_i32 = arith.constant 0 : i32
    %c0_i32_0 = arith.constant 0 : i32
    %c0_i32_1 = arith.constant 0 : i32
    return %arg0, %c0_i32, %c0_i32_0 : i32, i32, i32
  }
}

</mosaic_0001>

<bundles_post_ra>
// kernel: tpu_custom_call.1
= control target key start
LH: loop header
LB: loop body
LE: loop exit
PB: predicated region body
PF: predicated region fallthrough
CT: control target
= control target key end

     0   :  { %10 = vsyncpa [#allocation3], 0  ;;  %s862_s0 = inlined_call_operand.vmem [shape: f32[64,128], index: 0, kind: input, shape index: {}]   ;;  %s863_s1 = inlined_call_operand.vmem [shape: f32[64,2], index: 1, kind: input, shape index: {}]   ;;  %s864_s2 = inlined_call_operand.hbm [shape: f32[1,128,128], index: 2, kind: output, shape index: {0}]   ;;  %s865_s3 = inlined_call_operand.hbm [shape: f32[1,2,128], index: 3, kind: output, shape index: {1}]   ;;  %s866_s4 = inlined_call_operand.hbm [shape: f32[1,1,128], index: 4, kind: output, shape index: {2}]  }
   0x1   :  { %v766_v0 = vld [vmem:[%s862_s0] sm:$0xff]  ;;  %v771_v1 = vld [vmem:[%s862_s0 + $0x8] sm:$0xff]  ;;  %v779_v3 = vld [vmem:[%s862_s0 + $0x10] sm:$0xff] }
   0x2   :  { %114 = vxpose.xlu0.b32.start [1/8] (short) %v766_v0, 128  ;;  %v481_v2 = vadd.f32 %v771_v1, %v766_v0  ;;  %v89_v4 = vld [vmem:[%s862_s0 + $0x38] sm:$0xff]  ;;  %v90_v5 = vld [vmem:[%s863_s1] sm:$0xff]  ;;  %v88_v8 = vld [vmem:[%s862_s0 + $0x30] sm:$0xff] }
   0x3   :  { %373 = vxpose.xlu1.b32.start [1/8] (short) (narrow) %v90_v5, 8  ;;  %601 = vmatprep.subr.mxu0 %v89_v4  ;;  %v85_v7 = vld [vmem:[%s862_s0 + $0x18] sm:$0xff]  ;;  %v91_v9 = vld [vmem:[%s863_s1 + $0x8] sm:$0xff] }
   0x4   :  { %v482_v6 = vadd.f32 %v481_v2, %v779_v3  ;;  %602 = vmatpush3.msra.mxu0 %v89_v4 }
   0x5   :  { %603 = vmatprep.subr.mxu0 %v88_v8 }
   0x6   :  { %115 = vxpose.xlu0.b32.cont [2/8] (short) %v771_v1, 128  ;;  %v483_v10 = vadd.f32 %v482_v6, %v85_v7 }
   0x7   :  { %11 = vsyncpa [#allocation5], 0  ;;  %v86_v11 = vld [vmem:[%s862_s0 + $0x20] sm:$0xff]  ;;  %v87_v12 = vld [vmem:[%s862_s0 + $0x28] sm:$0xff]  ;;  %604 = vmatpush3.msra.mxu0 %v88_v8  ;;  %374 = vxpose.xlu1.b32.cont [2/8] (short) (narrow) %v91_v9, 8  ;;  %v731_v23 = vmov 0.0  }
   0x8   :  { %v484_v13 = vadd.f32 %v483_v10, %v86_v11  ;;  %605 = vmatprep.subr.mxu0 %v87_v12  ;;  %v92_v14 = vld [vmem:[%s863_s1 + $0x10] sm:$0xff]  ;;  %v93_v17 = vld [vmem:[%s863_s1 + $0x18] sm:$0xff]  ;;  %v94_v19 = vld [vmem:[%s863_s1 + $0x20] sm:$0xff]  ;;  %641 = vmatprep.subr.mxu1 %v731_v23  ;;  %80 = vst [vmem:[#allocation4] sm:$0x3] %v731_v23  ;;  %vm732_vm0 = vmmov 0  }
   0x9   :  { %606 = vmatpush3.msra.mxu0 %v87_v12  ;;  %v95_v20 = vld [vmem:[%s863_s1 + $0x28] sm:$0xff]  ;;  %v96_v21 = vld [vmem:[%s863_s1 + $0x30] sm:$0xff]  ;;  %v97_v22 = vld [vmem:[%s863_s1 + $0x38] sm:$0xff]  ;;  %81 = vst [vmem:[#allocation6] sm:$0x1] %v731_v23  ;;  %642 = vmatpush3.msra.mxu1 %v89_v4  ;;  %vm146_vm1 = vcmask 523264  }
   0xa   :  { %116 = vxpose.xlu0.b32.cont [3/8] (short) %v779_v3, 128  ;;  %v485_v15 = vadd.f32 %v484_v13, %v87_v12  ;;  %607 = vmatprep.subr.mxu0 %v86_v11  ;;  %s733_s1 = smov [#allocation4]   ;;  %s734_s21 = smov [#allocation6]  }
   0xb   :  { %608 = vmatpush3.msra.mxu0 %v86_v11  ;;  %375 = vxpose.xlu1.b32.cont [3/8] (short) (narrow) %v92_v14, 8  ;;  %s514_s20 = sshll.u32 %s733_s1, 4  ;;  %s524_s22 = sshll.u32 %s734_s21, 4  ;;  %s515_s20 = int_to_ptr.vmem [resolvable:$true] %s514_s20  ;;  %s525_s22 = int_to_ptr.vmem [resolvable:$true] %s524_s22 }
   0xc   :  { %v486_v16 = vadd.f32 %v485_v15, %v88_v8  ;;  %609 = vmatprep.subr.mxu0 %v85_v7  ;;  %643 = vmatprep.subr.mxu1 %v731_v23  ;;  %s667_s23 = scalar_lea.vmem %s515_s20, 32  ;;  %p672_p1 = scmp.lt.s32.totalorder %s515_s20, %s515_s20 }
   0xd   :  { %610 = vmatpush3.msra.mxu0 %v85_v7  ;;  %644 = vmatpush3.msra.mxu1 %v88_v8  ;;  %p668_p0 = scmp.ne.s32.totalorder %s515_s20, %s667_s23  ;;  %p673_p2 = scmp.lt.s32.totalorder %s667_s23, %s667_s23 }
   0xe   :  { %117 = vxpose.xlu0.b32.cont [4/8] (short) %v85_v7, 128  ;;  %v811_v18 = vadd.f32 %v486_v16, %v89_v4  ;;  %611 = vmatprep.subr.mxu0 %v779_v3 }
   0xf   :  { %612 = vmatpush3.msra.mxu0 %v779_v3  ;;  %376 = vxpose.xlu1.b32.cont [4/8] (short) (narrow) %v93_v17, 8  ;;  %v372_v49 = vld [vmem:[#allocation4] sm:$0x3]  ;;  %p674_p3 = por %p673_p2, %p672_p1 }
  0x10   :  { %613 = vmatprep.subr.mxu0 %v771_v1  ;;  %645 = vmatprep.subr.mxu1 %v731_v23  ;;  %v488_v41 = vrot.slane %v811_v18, 4  ;;  %v480_v47 = vld [vmem:[#allocation6] sm:$0x1] }
  0x11   :  { %614 = vmatpush3.msra.mxu0 %v771_v1  ;;  %646 = vmatpush3.msra.mxu1 %v87_v12  ;;  %p675_p4 = pnand %p674_p3, %p668_p0 }
  0x12   :  { %118 = vxpose.xlu0.b32.cont [5/8] (short) %v86_v11, 128  ;;  %615 = vmatprep.subr.mxu0 %v766_v0  ;;  %v489_v42 = vadd.f32 %v488_v41, %v811_v18 }
  0x13   :  { %616 = vmatpush3.msra.mxu0 %v766_v0  ;;  %377 = vxpose.xlu1.b32.cont [5/8] (short) (narrow) %v94_v19, 8 }
  0x14   :  { %647 = vmatprep.subr.mxu1 %v731_v23  ;;  %657 = vmatprep.mubr.msk.f32.mxu1 %vm732_vm0, %v731_v23  ;;  %v490_v43 = vrot.slane %v489_v42, 2 }
  0x15   :  { %648 = vmatpush3.msra.mxu1 %v86_v11 }
  0x16   :  { %119 = vxpose.xlu0.b32.cont [6/8] (short) %v87_v12, 128  ;;  %649 = vmatprep.subr.mxu1 %v731_v23  ;;  %v491_v44 = vadd.f32 %v490_v43, %v489_v42 }
  0x17   :  { %378 = vxpose.xlu1.b32.cont [6/8] (short) (narrow) %v95_v20, 8  ;;  %650 = vmatpush3.msra.mxu1 %v85_v7 }
  0x18   :  { %651 = vmatprep.subr.mxu1 %v731_v23  ;;  %v492_v45 = vrot.slane %v491_v44, 1 }
  0x19   :  { %652 = vmatpush3.msra.mxu1 %v779_v3 }
  0x1a   :  { %120 = vxpose.xlu0.b32.cont [7/8] (short) %v88_v8, 128  ;;  %653 = vmatprep.subr.mxu1 %v731_v23  ;;  %v493_v46 = vadd.f32 %v492_v45, %v491_v44 }
  0x1b   :  { %379 = vxpose.xlu1.b32.cont [7/8] (short) (narrow) %v96_v21, 8  ;;  %654 = vmatpush3.msra.mxu1 %v771_v1 }
  0x1c   :  { %655 = vmatprep.subr.mxu1 %v731_v23  ;;  %v494_v48 = vadd.f32 %v493_v46, %v480_v47 }
  0x1d   :  { %656 = vmatpush3.msra.mxu1 %v766_v0 }
  0x1e   :  { %121 = vxpose.xlu0.b32.end [8/8] (short) %v89_v4, 128  ;;  %495 = vst [vmem:[#allocation6] sm:$0x1] %v494_v48 }
  0x1f   :  { %380 = vxpose.xlu1.b32.end [8/8] (short) (narrow) %v97_v22, 8 }
  0x7e   :  { %v130_v24 = vpop.trf.xlu0 }
  0x7f   :  { %617 = vmatprep.mubr.msk.f32.mxu0 %vm146_vm1, %v130_v24  ;;  %v389_v25 = vpop.trf.xlu1 }
  0x80   :  { %658 = vmatmul.mubr.msk.f32.vlgmr.msra.gmra.mxu1 %vm146_vm1, %v389_v25 }
  0x82   :  { %v131_v26 = vpop.trf.xlu0 }
  0x83   :  { %618 = vmatmul.mubr.msk.f32.vlgmr.msra.gmra.mxu0 %vm146_vm1, %v131_v26 }
  0x86   :  { %v132_v27 = vpop.trf.xlu0 }
  0x87   :  { %620 = vmatprep.mubr.msk.f32.mxu0 %vm146_vm1, %v132_v27 }
  0x8a   :  { %v133_v28 = vpop.trf.xlu0 }
  0x8b   :  { %621 = vmatmul.mubr.msk.f32.gmra.mxu0 %vm146_vm1, %v133_v28 }
  0x8e   :  { %v134_v29 = vpop.trf.xlu0 }
  0x8f   :  { %623 = vmatprep.mubr.msk.f32.mxu0 %vm146_vm1, %v134_v29 }
  0x92   :  { %v135_v30 = vpop.trf.xlu0 }
  0x93   :  { %624 = vmatmul.mubr.msk.f32.gmra.mxu0 %vm146_vm1, %v135_v30 }
  0x96   :  { %v136_v31 = vpop.trf.xlu0 }
  0x97   :  { %626 = vmatprep.mubr.msk.f32.mxu0 %vm146_vm1, %v136_v31 }
  0x9a   :  { %v137_v32 = vpop.trf.xlu0 }
  0x9b   :  { %627 = vmatmul.mubr.msk.f32.gmra.mxu0 %vm146_vm1, %v137_v32 }
  0x9e   :  { %v138_v33 = vpop.trf.xlu0 }
  0x9f   :  { %629 = vmatprep.mubr.msk.f32.mxu0 %vm146_vm1, %v138_v33 }
  0xa2   :  { %v139_v34 = vpop.trf.xlu0 }
  0xa3   :  { %630 = vmatmul.mubr.msk.f32.gmra.mxu0 %vm146_vm1, %v139_v34 }
  0xa6   :  { %v140_v35 = vpop.trf.xlu0 }
  0xa7   :  { %632 = vmatprep.mubr.msk.f32.mxu0 %vm146_vm1, %v140_v35 }
  0xaa   :  { %v141_v36 = vpop.trf.xlu0 }
  0xab   :  { %633 = vmatmul.mubr.msk.f32.gmra.mxu0 %vm146_vm1, %v141_v36 }
  0xae   :  { %v142_v37 = vpop.trf.xlu0 }
  0xaf   :  { %635 = vmatprep.mubr.msk.f32.mxu0 %vm146_vm1, %v142_v37 }
  0xb2   :  { %v143_v38 = vpop.trf.xlu0 }
  0xb3   :  { %636 = vmatmul.mubr.msk.f32.gmra.mxu0 %vm146_vm1, %v143_v38 }
  0xb6   :  { %v144_v39 = vpop.trf.xlu0 }
  0xb7   :  { %638 = vmatprep.mubr.msk.f32.mxu0 %vm146_vm1, %v144_v39 }
  0xba   :  { %v145_v40 = vpop.trf.xlu0 }
  0xbb   :  { %639 = vmatmul.mubr.msk.f32.gmra.mxu0 %vm146_vm1, %v145_v40 }
 0x140   :  { %v474_v50 = vpop.f32.mrf.mxu1 }
 0x141   :  { %v478_v51 = vadd.f32 %v474_v50, %v372_v49 }
 0x142   :  { %v659_v53 = vpop.f32.mrf.mxu1 }
 0x143   :  { %v619_v52 = vpop.f32.mrf.mxu0  ;;  %479 = vst [vmem:[#allocation4] sm:$0x3] %v478_v51 }
 0x145   :  { %v261_v54 = vpop.f32.mrf.mxu0 }
 0x146   :  { %678 = shalt.err (!%p675_p4)
}
 0x147   :  { %517 = dma.vmem_to_hbm [thread:$0]  %s515_s20, 32, %s865_s3, [#allocation5]   ;;  %357 = vst [vmem:[#allocation2 + $0x8] sm:$0xff] %v619_v52 }
 0x148   :  { %s687_s26 = scalar_lea.vmem %s525_s22, 16  ;;  %s691_s27 = scalar_lea.vmem %s525_s22, 32 }
 0x149   :  { %p688_p5 = scmp.ne.s32.totalorder %s525_s22, %s687_s26  ;;  %p692_p6 = scmp.lt.s32.totalorder %s525_s22, %s525_s22 }
 0x14a   :  { %p693_p7 = scmp.lt.s32.totalorder %s691_s27, %s687_s26 }
 0x14c   :  { %p694_p8 = por %p693_p7, %p692_p6 }
 0x14e   :  { %p695_p9 = pnand %p694_p8, %p688_p5 }
 0x150   :  { %698 = shalt.err (!%p695_p9)
}
 0x151   :  { %527 = dma.vmem_to_hbm [thread:$0]  %s525_s22, 16, %s866_s4, [#allocation5]   ;;  %356 = vst [vmem:[#allocation2] sm:$0xff] %v261_v54  ;;  %v622_v55 = vpop.f32.mrf.mxu0 }
 0x152   :  { %359 = vst [vmem:[#allocation2 + $0x18] sm:$0xff] %v622_v55  ;;  %s735_s3 = smov [#allocation2]  }
 0x153   :  { %v271_v56 = vpop.f32.mrf.mxu0  ;;  %s501_s4 = sshll.u32 %s735_s3, 4  ;;  %s502_s4 = int_to_ptr.vmem [resolvable:$true] %s501_s4 }
 0x154   :  { %358 = vst [vmem:[#allocation2 + $0x10] sm:$0xff] %v271_v56  ;;  %s707_s30 = scalar_lea.vmem %s502_s4, 2048  ;;  %p712_p11 = scmp.lt.s32.totalorder %s502_s4, %s502_s4 }
 0x155   :  { %v625_v57 = vpop.f32.mrf.mxu0  ;;  %p708_p10 = scmp.ne.s32.totalorder %s502_s4, %s707_s30  ;;  %p713_p12 = scmp.lt.s32.totalorder %s707_s30, %s707_s30 }
 0x156   :  { %361 = vst [vmem:[#allocation2 + $0x28] sm:$0xff] %v625_v57 }
 0x157   :  { %v281_v58 = vpop.f32.mrf.mxu0  ;;  %p714_p13 = por %p713_p12, %p712_p11 }
 0x158   :  { %360 = vst [vmem:[#allocation2 + $0x20] sm:$0xff] %v281_v58 }
 0x159   :  { %p715_p0 = pnand %p714_p13, %p708_p10 }
 0x15b   :  { %v628_v59 = vpop.f32.mrf.mxu0 }
 0x15c   :  { %363 = vst [vmem:[#allocation2 + $0x38] sm:$0xff] %v628_v59 }
 0x15d   :  { %v291_v60 = vpop.f32.mrf.mxu0 }
 0x15e   :  { %362 = vst [vmem:[#allocation2 + $0x30] sm:$0xff] %v291_v60 }
 0x163   :  { %v631_v61 = vpop.f32.mrf.mxu0 }
 0x164   :  { %365 = vst [vmem:[#allocation2 + $0x48] sm:$0xff] %v631_v61 }
 0x165   :  { %v301_v62 = vpop.f32.mrf.mxu0 }
 0x166   :  { %364 = vst [vmem:[#allocation2 + $0x40] sm:$0xff] %v301_v62 }
 0x16b   :  { %v634_v63 = vpop.f32.mrf.mxu0 }
 0x16c   :  { %367 = vst [vmem:[#allocation2 + $0x58] sm:$0xff] %v634_v63 }
 0x16d   :  { %v311_v0 = vpop.f32.mrf.mxu0 }
 0x16e   :  { %366 = vst [vmem:[#allocation2 + $0x50] sm:$0xff] %v311_v0 }
 0x173   :  { %v637_v1 = vpop.f32.mrf.mxu0 }
 0x174   :  { %369 = vst [vmem:[#allocation2 + $0x68] sm:$0xff] %v637_v1 }
 0x175   :  { %v321_v2 = vpop.f32.mrf.mxu0 }
 0x176   :  { %368 = vst [vmem:[#allocation2 + $0x60] sm:$0xff] %v321_v2 }
 0x17b   :  { %v640_v3 = vpop.f32.mrf.mxu0 }
 0x17c   :  { %371 = vst [vmem:[#allocation2 + $0x78] sm:$0xff] %v640_v3 }
 0x17d   :  { %v331_v4 = vpop.f32.mrf.mxu0 }
 0x17e   :  { %370 = vst [vmem:[#allocation2 + $0x70] sm:$0xff] %v331_v4 }
 0x17f   :  { %718 = shalt.err (!%p715_p0)
}
 0x180   :  { %s736_s5 = smov 128   ;;  %s737_s6 = smov 8  }
 0x181   :  { %507 = dma.vmem_to_hbm [thread:$0]  %s502_s4, 2048, %s864_s2, [#allocation3], %s736_s5, %s736_s5, %s737_s6  }
 0x182   :  { %727 = dma.done.wait [#allocation3], 2048  }
 0x183   :  { %728 = vsyncadd [#allocation3], 4294965248 }
 0x184   :  { %729 = dma.done.wait [#allocation5], 48  }
 0x185   :  { %730 = vsyncadd [#allocation5], 4294967248 }
 0x186   :  { %537 = vsyncpa [#allocation3], 1 }
 0x187   :  { %538 = vsyncpa [#allocation5], 1 }

</bundles_post_ra>
